<compile_context>
chip_gen: v7x
topology: tpu7x:2x2x1
jax: 0.10.0
libtpu: 0.0.40
codegen_flags: <defaults>
</compile_context>

<pallas_src>
import math
from functools import partial

import jax
import jax.numpy as jnp
from jax import lax
from jax.experimental import pallas as pl
from jax.experimental.pallas import tpu as pltpu


# --------------------------------------------------------------------------
# Tiling helper: largest tile <= preferred that divides dim and is a multiple
# of align; full dim (always legal) as fallback.
# --------------------------------------------------------------------------
def _pick_tile(dim, preferred, align):
    if dim <= preferred:
        return dim
    t = (preferred // align) * align
    while t >= align:
        if dim % t == 0:
            return t
        t -= align
    return dim


# --------------------------------------------------------------------------
# Tiled y = x @ w.T with w in nn.Linear (N, K) layout.
# --------------------------------------------------------------------------
def _matmul_nt_kernel(x_ref, w_ref, o_ref, acc_ref):
    @pl.when(pl.program_id(2) == 0)
    def _():
        acc_ref[...] = jnp.zeros(acc_ref.shape, acc_ref.dtype)

    acc_ref[...] += lax.dot_general(
        x_ref[...], w_ref[...],
        dimension_numbers=(((1,), (1,)), ((), ())),   # contract K of both (NT)
        preferred_element_type=jnp.float32)

    @pl.when(pl.program_id(2) == pl.num_programs(2) - 1)
    def _():
        o_ref[...] = acc_ref[...].astype(o_ref.dtype)


def matmul_nt(x, w, *, tm=256, tn=256, tk=512):
    """x: (M, K), w: (N, K)  ->  (M, N) = x @ w.T."""
    M, K = x.shape
    N, K2 = w.shape
    assert K == K2
    tm = _pick_tile(M, tm, 8)
    tn = _pick_tile(N, tn, 128)
    tk = _pick_tile(K, tk, 128)
    itemsize = jnp.dtype(x.dtype).itemsize
    return pl.pallas_call(
        _matmul_nt_kernel,
        out_shape=jax.ShapeDtypeStruct((M, N), x.dtype),
        grid=(M // tm, N // tn, K // tk),
        in_specs=[
            pl.BlockSpec((tm, tk), lambda i, j, k: (i, k)),
            pl.BlockSpec((tn, tk), lambda i, j, k: (j, k)),
        ],
        out_specs=pl.BlockSpec((tm, tn), lambda i, j, k: (i, j)),
        scratch_shapes=[pltpu.VMEM((tm, tn), jnp.float32)],
        compiler_params=pltpu.CompilerParams(
            dimension_semantics=("parallel", "parallel", "arbitrary"),
            vmem_limit_bytes=48 * 1024 * 1024),
        cost_estimate=pl.CostEstimate(
            flops=2 * M * N * K, transcendentals=0,
            bytes_accessed=itemsize * (M * K + N * K + M * N)),
    )(x, w)


# --------------------------------------------------------------------------
# RoPE on the K heads of the fused qkv output (applied exactly once).
# rotate_half(x) = concat(-x2, x1); out = x*cos + rotate_half(x)*sin.
# --------------------------------------------------------------------------
def _rope_kernel(x_ref, cos_ref, sin_ref, o_ref, *, half):
    x = x_ref[...].astype(jnp.float32)                               # (ts, D)
    rot = jnp.concatenate([-x[:, half:], x[:, :half]], axis=-1)
    o_ref[...] = (x * cos_ref[...] + rot * sin_ref[...]).astype(o_ref.dtype)


def rope_k(qkv, cos, sin, *, batch, seq, num_heads, num_kv_heads, head_dim):
    """qkv: (B*S, (NH+2*NKV)*D) -> k_rot: (B*S, NKV*D)."""
    M = batch * seq
    D = head_dim
    ts = _pick_tile(seq, 256, 8)
    nq = seq // ts
    NH = num_heads
    return pl.pallas_call(
        partial(_rope_kernel, half=D // 2),
        out_shape=jax.ShapeDtypeStruct((M, num_kv_heads * D), qkv.dtype),
        grid=(batch, num_kv_heads, nq),
        in_specs=[
            pl.BlockSpec((ts, D), lambda b, kv, si: (b * nq + si, NH + kv)),
            pl.BlockSpec((ts, D), lambda b, kv, si: (si, 0)),
            pl.BlockSpec((ts, D), lambda b, kv, si: (si, 0)),
        ],
        out_specs=pl.BlockSpec((ts, D), lambda b, kv, si: (b * nq + si, kv)),
        compiler_params=pltpu.CompilerParams(
            dimension_semantics=("parallel", "parallel", "parallel")),
    )(qkv, cos, sin)


# --------------------------------------------------------------------------
# Flash attention (online softmax over KV tiles).  Q is rotated in-kernel once
# per output tile (cached in scratch); K arrives pre-rotated; GQA handled by
# the h // groups index maps (== repeat_interleave on the head dim).
# --------------------------------------------------------------------------
def _flash_kernel(q_ref, k_ref, v_ref, cos_ref, sin_ref, o_ref,
                  qe_sc, m_sc, l_sc, acc_sc, *, scale, half):
    ki = pl.program_id(3)

    @pl.when(ki == 0)
    def _():
        q = q_ref[...].astype(jnp.float32)                           # (tq, D)
        rot = jnp.concatenate([-q[:, half:], q[:, :half]], axis=-1)
        qe_sc[...] = (q * cos_ref[...] + rot * sin_ref[...]).astype(qe_sc.dtype)
        m_sc[...] = jnp.full(m_sc.shape, -jnp.inf, m_sc.dtype)
        l_sc[...] = jnp.zeros(l_sc.shape, l_sc.dtype)
        acc_sc[...] = jnp.zeros(acc_sc.shape, acc_sc.dtype)

    k = k_ref[...]                                    # (tkv, D), pre-rotated
    v = v_ref[...]                                    # (tkv, D)
    # s = q @ k.T without materializing a transpose (contract last dims).
    s = lax.dot_general(qe_sc[...], k,
                        dimension_numbers=(((1,), (1,)), ((), ())),
                        preferred_element_type=jnp.float32) * scale  # (tq, tkv)

    m_prev = m_sc[...]
    m_new = jnp.maximum(m_prev, jnp.max(s, axis=-1, keepdims=True))
    alpha = jnp.exp(m_prev - m_new)
    p = jnp.exp(s - m_new)
    l_sc[...] = alpha * l_sc[...] + jnp.sum(p, axis=-1, keepdims=True)
    acc_sc[...] = alpha * acc_sc[...] + lax.dot_general(
        p.astype(v.dtype), v,
        dimension_numbers=(((1,), (0,)), ((), ())),
        preferred_element_type=jnp.float32)
    m_sc[...] = m_new

    @pl.when(ki == pl.num_programs(3) - 1)
    def _():
        # TODO(synk): pl.reciprocal(..., approx=True) would move this divide to
        # the EUP on hardware; exact division kept for maximum portability.
        o_ref[...] = (acc_sc[...] / l_sc[...]).astype(o_ref.dtype)


def flash_attention(qkv, k_rot, cos, sin, *, batch, seq, num_heads,
                    num_kv_heads, head_dim):
    M = batch * seq
    D = head_dim
    NH, NKV = num_heads, num_kv_heads
    groups = NH // NKV
    tq = _pick_tile(seq, 256, 8)
    tkv = _pick_tile(seq, 256, 8)
    nq = seq // tq
    nk = seq // tkv
    kernel = partial(_flash_kernel, scale=1.0 / math.sqrt(D), half=D // 2)
    return pl.pallas_call(
        kernel,
        out_shape=jax.ShapeDtypeStruct((M, NH * D), qkv.dtype),
        grid=(batch, NH, nq, nk),
        in_specs=[
            # Q column-block of the fused projection (head h).
            pl.BlockSpec((tq, D), lambda b, h, qi, ki: (b * nq + qi, h)),
            # Pre-rotated K, GQA: query head h uses kv head h // groups.
            pl.BlockSpec((tkv, D), lambda b, h, qi, ki: (b * nk + ki, h // groups)),
            # V column-block of the fused projection.
            pl.BlockSpec((tkv, D),
                         lambda b, h, qi, ki: (b * nk + ki, NH + NKV + h // groups)),
            # cos / sin rows for the current q tile (resident across ki).
            pl.BlockSpec((tq, D), lambda b, h, qi, ki: (qi, 0)),
            pl.BlockSpec((tq, D), lambda b, h, qi, ki: (qi, 0)),
        ],
        out_specs=pl.BlockSpec((tq, D), lambda b, h, qi, ki: (b * nq + qi, h)),
        scratch_shapes=[
            pltpu.VMEM((tq, D), qkv.dtype),     # rotated-Q cache
            pltpu.VMEM((tq, 1), jnp.float32),   # running max
            pltpu.VMEM((tq, 1), jnp.float32),   # running denominator
            pltpu.VMEM((tq, D), jnp.float32),   # output accumulator
        ],
        compiler_params=pltpu.CompilerParams(
            dimension_semantics=("parallel", "parallel", "parallel", "arbitrary"),
            vmem_limit_bytes=48 * 1024 * 1024),
    )(qkv, k_rot, qkv, cos, sin)
    # TODO(synk): a GQA-grouped grid (B, NKV, q-tiles, kv-tiles) with a
    # groups-wide Q block would also dedupe the K/V HBM fetches across the
    # query heads of a group.


# --------------------------------------------------------------------------
# Rotary tables + full forward.
# --------------------------------------------------------------------------
def rotary_cos_sin(seq_len, head_dim, theta):
    inv_freq = 1.0 / (
        theta ** (jnp.arange(0, head_dim, 2, dtype=jnp.float32) / head_dim))
    pos = jnp.arange(seq_len, dtype=jnp.float32)
    freqs = pos[:, None] * inv_freq[None, :]                 # (S, D/2)
    emb = jnp.concatenate([freqs, freqs], axis=-1)           # (S, D)
    return jnp.cos(emb), jnp.sin(emb)


def llama_sdpa_attention(x, w_qkv, wo, *, num_heads, num_kv_heads, rope_theta):
    """LlamaSdpaAttention.forward (mask=None, no cache, eval).
    w_qkv = concat([Wq, Wk, Wv], axis=0) in nn.Linear (out, in) layout."""
    B, S, HID = x.shape
    D = HID // num_heads
    if D % 128 != 0:
        # TODO(synk): head_dim that is not a multiple of 128 needs a different
        # column-blocking scheme; Llama uses head_dim=128.
        raise NotImplementedError("head_dim must be a multiple of 128")
    cos, sin = rotary_cos_sin(S, D, rope_theta)              # (S, D) f32

    x2d = x.reshape(B * S, HID)
    qkv = matmul_nt(x2d, w_qkv)                              # fused q/k/v proj
    k_rot = rope_k(qkv, cos, sin, batch=B, seq=S, num_heads=num_heads,
                   num_kv_heads=num_kv_heads, head_dim=D)
    attn = flash_attention(qkv, k_rot, cos, sin, batch=B, seq=S,
                           num_heads=num_heads, num_kv_heads=num_kv_heads,
                           head_dim=D)                       # (B*S, HID)
    out = matmul_nt(attn, wo)                                # o_proj
    return out.reshape(B, S, HID)


# --------------------------------------------------------------------------
# Pure-JAX reference (mirrors the PyTorch forward) for a correctness check.
# --------------------------------------------------------------------------
def reference(x, wq, wk, wv, wo, num_heads, num_kv_heads, theta):
    B, S, HID = x.shape
    D = HID // num_heads
    q = (x @ wq.T).reshape(B, S, num_heads, D).transpose(0, 2, 1, 3)
    k = (x @ wk.T).reshape(B, S, num_kv_heads, D).transpose(0, 2, 1, 3)
    v = (x @ wv.T).reshape(B, S, num_kv_heads, D).transpose(0, 2, 1, 3)
    cos, sin = rotary_cos_sin(S, D, theta)

    def rot_half(t):
        return jnp.concatenate([-t[..., D // 2:], t[..., :D // 2]], axis=-1)

    qe = q * cos + rot_half(q) * sin
    ke = k * cos + rot_half(k) * sin
    rep = num_heads // num_kv_heads
    ke = jnp.repeat(ke, rep, axis=1)
    ve = jnp.repeat(v, rep, axis=1)
    s = jnp.einsum("bhqd,bhkd->bhqk", qe, ke) / math.sqrt(D)
    p = jax.nn.softmax(s, axis=-1)
    o = jnp.einsum("bhqk,bhkd->bhqd", p, ve)
    o = o.transpose(0, 2, 1, 3).reshape(B, S, HID)
    return o @ wo.T


if __name__ == "__main__":
    # Small Llama-style config: hidden=256, 2 attention heads, 1 kv head (GQA),
    # head_dim=128, seq=8, batch=2, rope_theta=10000, attention_bias=False.
    B, S, HID = 2, 8, 256
    NUM_HEADS, NUM_KV_HEADS = 2, 1
    ROPE_THETA = 10000.0
    D = HID // NUM_HEADS

    key = jax.random.PRNGKey(0)
    k1, k2, k3, k4, k5 = jax.random.split(key, 5)
    init = 0.02
    wq = jax.random.normal(k1, (NUM_HEADS * D, HID), jnp.float32) * init
    wk = jax.random.normal(k2, (NUM_KV_HEADS * D, HID), jnp.float32) * init
    wv = jax.random.normal(k3, (NUM_KV_HEADS * D, HID), jnp.float32) * init
    wo = jax.random.normal(k4, (HID, HID), jnp.float32) * init
    x = jax.random.normal(k5, (B, S, HID), jnp.float32)

    # Fuse the q/k/v projection weights once (load time), torch (out,in) layout.
    w_qkv = jnp.concatenate([wq, wk, wv], axis=0)

    out = llama_sdpa_attention(x, w_qkv, wo, num_heads=NUM_HEADS,
                               num_kv_heads=NUM_KV_HEADS, rope_theta=ROPE_THETA)
    out = jax.block_until_ready(out)

    ref = reference(x, wq, wk, wv, wo, NUM_HEADS, NUM_KV_HEADS, ROPE_THETA)
    assert out.shape == (B, S, HID)
    max_err = float(jnp.max(jnp.abs(out - ref)))
    assert jnp.allclose(out, ref, rtol=2e-3, atol=2e-3), f"mismatch: {max_err}"

    # TODO(synk): KV-cache (past_key_value) update and the attention_mask /
    # cache_position slicing paths are not exercised (mask=None, no cache).
    print("KERNEL_OK")
</pallas_src>

<mosaic_0001>
module attributes {stable_mosaic.version = 11 : i64} {
  func.func @_matmul_nt_kernel(%arg0: i32, %arg1: i32, %arg2: i32, %arg3: memref<16x256xf32, #tpu.memory_space<vmem>>, %arg4: memref<256x256xf32, #tpu.memory_space<vmem>>, %arg5: memref<16x256xf32, #tpu.memory_space<vmem>>, %arg6: memref<16x256xf32, #tpu.memory_space<vmem>>) attributes {dimension_semantics = [#tpu.dimension_semantics<parallel>, #tpu.dimension_semantics<parallel>, #tpu.dimension_semantics<arbitrary>], iteration_bounds = array<i64: 1, 2, 1>, scalar_prefetch = 0 : i64, scratch_operands = 1 : i64, tpu.core_type = #tpu.core_type<tc>, window_params = [{transform_indices = @transform_0, window_bounds = array<i64: 16, 256>}, {transform_indices = @transform_1, window_bounds = array<i64: 256, 256>}, {transform_indices = @transform_2, window_bounds = array<i64: 16, 256>}]} {
    %c0_i32 = arith.constant 0 : i32
    %0 = arith.cmpi eq, %arg2, %c0_i32 : i32
    %1 = arith.extui %0 : i1 to i32
    %c0_i32_0 = arith.constant 0 : i32
    %2 = arith.cmpi ne, %1, %c0_i32_0 : i32
    scf.if %2 {
      %cst_10 = arith.constant 0.000000e+00 : f32
      %12 = vector.broadcast %cst_10 : f32 to vector<16x256xf32>
      %c0_11 = arith.constant 0 : index
      %c0_12 = arith.constant 0 : index
      %13 = vector.load %arg6[%c0_11, %c0_12] : memref<16x256xf32, #tpu.memory_space<vmem>>, vector<16x256xf32>
      tpu.vector_store %arg6[%c0_11, %c0_12], %12 {strides = array<i32>} : memref<16x256xf32, #tpu.memory_space<vmem>>, vector<16x256xf32>,
    } else {
    }
    %c0 = arith.constant 0 : index
    %c0_1 = arith.constant 0 : index
    %3 = vector.load %arg6[%c0, %c0_1] : memref<16x256xf32, #tpu.memory_space<vmem>>, vector<16x256xf32>
    %c0_2 = arith.constant 0 : index
    %c0_3 = arith.constant 0 : index
    %4 = vector.load %arg3[%c0_2, %c0_3] : memref<16x256xf32, #tpu.memory_space<vmem>>, vector<16x256xf32>
    %c0_4 = arith.constant 0 : index
    %c0_5 = arith.constant 0 : index
    %5 = vector.load %arg4[%c0_4, %c0_5] : memref<256x256xf32, #tpu.memory_space<vmem>>, vector<256x256xf32>
    %cst = arith.constant dense<0.000000e+00> : vector<16x256xf32>
    %6 = tpu.matmul %4, %5, %cst {dimension_numbers = #tpu.dot_dimension_numbers<[1], [1], [0], [0], [0, 0, 1, 0], [], []>} : vector<16x256xf32>, vector<256x256xf32>, vector<16x256xf32> -> vector<16x256xf32>
    %7 = arith.addf %3, %6 : vector<16x256xf32>
    %c0_6 = arith.constant 0 : index
    %c0_7 = arith.constant 0 : index
    %8 = vector.load %arg6[%c0_6, %c0_7] : memref<16x256xf32, #tpu.memory_space<vmem>>, vector<16x256xf32>
    tpu.vector_store %arg6[%c0_6, %c0_7], %7 {strides = array<i32>} : memref<16x256xf32, #tpu.memory_space<vmem>>, vector<16x256xf32>,
    %c0_i32_8 = arith.constant 0 : i32
    %9 = arith.cmpi eq, %arg2, %c0_i32_8 : i32
    %10 = arith.extui %9 : i1 to i32
    %c0_i32_9 = arith.constant 0 : i32
    %11 = arith.cmpi ne, %10, %c0_i32_9 : i32
    scf.if %11 {
      %c0_10 = arith.constant 0 : index
      %c0_11 = arith.constant 0 : index
      %12 = vector.load %arg6[%c0_10, %c0_11] : memref<16x256xf32, #tpu.memory_space<vmem>>, vector<16x256xf32>
      %c0_12 = arith.constant 0 : index
      %c0_13 = arith.constant 0 : index
      %13 = vector.load %arg5[%c0_12, %c0_13] : memref<16x256xf32, #tpu.memory_space<vmem>>, vector<16x256xf32>
      tpu.vector_store %arg5[%c0_12, %c0_13], %12 {strides = array<i32>} : memref<16x256xf32, #tpu.memory_space<vmem>>, vector<16x256xf32>,
    } else {
    }
    return
  }
  func.func @transform_0(%arg0: i32, %arg1: i32, %arg2: i32) -> (i32, i32) {
    %c0_i32 = arith.constant 0 : i32
    return %arg0, %arg2 : i32, i32
  }
  func.func @transform_1(%arg0: i32, %arg1: i32, %arg2: i32) -> (i32, i32) {
    %c0_i32 = arith.constant 0 : i32
    return %arg1, %arg2 : i32, i32
  }
  func.func @transform_2(%arg0: i32, %arg1: i32, %arg2: i32) -> (i32, i32) {
    %c0_i32 = arith.constant 0 : i32
    return %arg0, %arg1 : i32, i32
  }
}

</mosaic_0001>

<bundles_post_ra>
// kernel: tpu_custom_call.1
= control target key start
LH: loop header
LB: loop body
LE: loop exit
PB: predicated region body
PF: predicated region fallthrough
CT: control target
= control target key end

     0   :  { %7 = vsyncpa [#allocation4], 0  ;;  %s1178_s0 = inlined_call_operand.hbm [shape: f32[16,256], index: 0, kind: input, shape index: {}]   ;;  %s1179_s1 = inlined_call_operand.hbm [shape: f32[512,256], index: 1, kind: input, shape index: {}]   ;;  %s1180_s2 = inlined_call_operand.hbm [shape: f32[16,512], index: 2, kind: output, shape index: {}]  }
   0x1   :  { %8 = vsyncpa [#allocation7], 0 }
   0x2   :  { %10 = vsyncpa [#allocation7 + $0x1], 0 }
   0x3   :  { %11 = vsyncpa [#allocation5], 0 }
   0x4   :  { %13 = vsyncpa [#allocation5 + $0x1], 0  ;;  %s886_s9 = smov 0   ;;  %s888_s10 = smov 0  }
   0x5   :  { %s890_s11 = smov 0   ;;  %s892_s12 = smov 0  }
   0x6   :  { %s894_s13 = smov 0   ;;  %s896_s14 = smov 0  }
   0x7 LB: > { %s522_s15 = sadd.s32 4294967295, %s861_s14   ;;  %s523_s16 = sadd.s32 4294967294, %s861_s14   ;;  %s861_s14 = sphi %s896_s14, %s19_s14   ;;  %s857_s13 = sphi %s894_s13, %s1204_s13   ;;  %s853_s12 = sphi %s892_s12, %s1203_s12   ;;  %s849_s11 = sphi %s890_s11, %s1202_s11   ;;  %s845_s10 = sphi %s888_s10, %s1201_s10   ;;  %s841_s9 = sphi %s886_s9, %s1200_s9  }
   0x8   : > { %p88_p0 = scmp.ne.s32.totalorder %s845_s10, %s841_s9  ;;  %p920_p1 = scmp.eq.s32.totalorder %s522_s15, 0 }
   0x9   : > { %p924_p2 = scmp.eq.s32.totalorder %s522_s15, 1  ;;  %p120_p3 = scmp.eq.s32.totalorder %s523_s16, 1 }
   0xa   : > { %s1185_s17 = scalar_select %p920_p1, 1, 0 }
   0xb   : > { %s1186_s18 = scalar_select %p924_p2, 1, 0 }
   0xc   : > { %p930_p4 = por %p920_p1, %p88_p0  ;;  %p524_p5 = scmp.ge.s32.totalorder %s861_s14, 1 }
   0xd   : > { %p935_p6 = por %p120_p3, %p88_p0  ;;  %p127_p7 = scmp.lt.s32.totalorder %s861_s14, 3 }
   0xe   : > { %s1187_s19 = scalar_select %p930_p4, 1, 0 }
   0xf   : > { %s1188_s20 = scalar_select %p935_p6, 1, 0 }
  0x10   : > { %p940_p8 = pnand %p524_p5, %p127_p7  ;;  %s863_s22 = smov [#allocation3]  }
  0x11   : > { %s145_s23 = sshll.u32 %s863_s22, 4  ;;  %s34_s25 = sadd.s32 1, %s857_s13  ;;  %s146_s23 = int_to_ptr.vmem [resolvable:$true] %s145_s23 }
  0x12   : > { %s1189_s21 = scalar_select %p940_p8, 1, 0 }
  0x13   : > { %p647_p9 = pneg %p940_p8  ;;  %s717_s28 = scalar_lea.hbm %s1178_s0, 512 }
  0x14   : > { %p718_p12 = scmp.ne.s32.totalorder %s1178_s0, %s717_s28  ;;  %p724_p5 = scmp.lt.u32.totalorder %s717_s28, %s1178_s0 }
  0x15   : > { %p949_p11 = pnand %p647_p9, %p920_p1 }
  0x17   : > { %p719_p13 = pneg %p949_p11 }
  0x19   : > { %p720_p0 = pnand %p719_p13, %p718_p12 }
  0x1b   : > { %p721_p3 = pneg %p720_p0 }
  0x1d   : > { %p726_p7 = pnand %p724_p5, %p721_p3 }
  0x1f   : > { %729 = shalt.err (!%p726_p7)
}
  0x20   : > { %s730_s5 = scalar_lea.vmem %s146_s23, 512  ;;  %p738_p4 = scmp.lt.s32.totalorder %s146_s23, %s146_s23 }
  0x21   : > { %p731_p9 = scmp.ne.s32.totalorder %s146_s23, %s730_s5  ;;  %p739_p1 = scmp.lt.s32.totalorder %s730_s5, %s730_s5 }
  0x23   : > { %p733_p10 = pnand %p731_p9, %p719_p13  ;;  %p740_p8 = por %p739_p1, %p738_p4 }
  0x25   : > { %p734_p6 = pneg %p733_p10 }
  0x27   : > { %p741_p2 = pnand %p740_p8, %p734_p6 }
  0x29   : > { %744 = shalt.err (!%p741_p2)
}
  0x2a   : > { %s864_s6 = smov 256   ;;  %s865_s7 = smov 16  }
  0x2b   : > { %650 = dma.hbm_to_vmem [thread:$0]  (!%p949_p11), %s1178_s0, 512, %s146_s23, [#allocation4], %s864_s6, %s864_s6, %s865_s7  }
  0x2c   : > { %p36_p1 = scmp.ge.s32.totalorder %s34_s25, 2  ;;  %s75_s16 = sadd.s32 1, %s849_s11 }
  0x2d   : > { %p82_p2 = scmp.ne.s32.totalorder %s849_s11, %s845_s10  ;;  %p83_p4 = scmp.eq.s32.totalorder %s861_s14, 0 }
  0x2e   : > { %s1206_s25 = smov (%p36_p1, %s34_s25), 0  ;;  %p1192_p8 = scmp.ne.s32.totalorder %s1186_s18, 0 }
  0x2f   : > { %p979_p6 = por %p83_p4, %p82_p2  ;;  %s70_s26 = ssub.s32 %s857_s13, %s1206_s25 }
  0x30   : > { %p985_p10 = por %p1192_p8, %p82_p2  ;;  %p660_p12 = scmp.lt.s32.totalorder %s861_s14, 2 }
  0x31   : > { %p73_p11 = scmp.eq.s32.totalorder %s70_s26, 0  ;;  %s159_s23 = sand.u32 1, %s849_s11  }
  0x32   : > { %s527_s27 = sshll.u32 %s159_s23, 9  ;;  %s541_s29 = sshll.u32 %s857_s13, 13 }
  0x33   : > { %s994_s28 = scalar_select %p73_p11, %s849_s11, %s75_s16  }
  0x34   : > { %s1000_s4 = scalar_lea.hbm %s1179_s1, %s541_s29  ;;  %s163_s18 = scalar_lea.vmem [#allocation6], %s527_s27 }
  0x35   : > { %s173_s5 = sshll.u32 %s163_s18, 4  ;;  %p1006_p13 = pnand %p660_p12, %p979_p6  ;;  %s1002_s5 = int_to_ptr.vmem [resolvable:$true] %s173_s5 }
  0x36   : > { %s1010_s15 = scalar_lea.sflag [#allocation7], %s159_s23  ;;  %s745_s16 = scalar_lea.hbm %s1000_s4, 8192 }
  0x37   : > { %p746_p0 = scmp.ne.s32.totalorder %s1000_s4, %s745_s16  ;;  %p747_p3 = pneg %p1006_p13 }
  0x38   : > { %s750_s22 = scalar_lea.hbm %s1179_s1, 16384  ;;  %p751_p9 = scmp.lt.u32.totalorder %s1000_s4, %s1179_s1 }
  0x39   : > { %p748_p5 = pnand %p747_p3, %p746_p0  ;;  %p752_p1 = scmp.lt.u32.totalorder %s750_s22, %s745_s16 }
  0x3a   : > { %p754_p4 = scmp.lt.u32.totalorder %s745_s16, %s1000_s4 }
  0x3b   : > { %p749_p7 = pneg %p748_p5  ;;  %p753_p2 = por %p752_p1, %p751_p9 }
  0x3d   : > { %p755_p6 = por %p754_p4, %p753_p2 }
  0x3f   : > { %p756_p8 = pnand %p755_p6, %p749_p7 }
  0x41   : > { %759 = shalt.err (!%p756_p8)
}
  0x42   : > { %s760_s23 = scalar_lea.vmem %s1002_s5, 8192  ;;  %s866_s3 = smov [#allocation6]  }
  0x43   : > { %p761_p12 = scmp.ne.s32.totalorder %s1002_s5, %s760_s23  ;;  %s765_s18 = sshll.u32 %s866_s3, 4  ;;  %s766_s18 = int_to_ptr.vmem [resolvable:$false] %s765_s18 }
  0x44   : > { %s767_s26 = scalar_lea.vmem %s766_s18, 16384  ;;  %p768_p5 = scmp.lt.s32.totalorder %s1002_s5, %s766_s18 }
  0x45   : > { %p763_p11 = pnand %p761_p12, %p747_p3  ;;  %p769_p9 = scmp.lt.s32.totalorder %s767_s26, %s760_s23 }
  0x47   : > { %p764_p0 = pneg %p763_p11  ;;  %p770_p1 = por %p769_p9, %p768_p5 }
  0x49   : > { %p771_p2 = pnand %p770_p1, %p764_p0 }
  0x4b   : > { %774 = shalt.err (!%p771_p2)
}
  0x4c   : > { %654 = dma.hbm_to_vmem [thread:$0]  (!%p1006_p13), %s1000_s4, 8192, %s1002_s5, %s1010_s15, %s864_s6, %s864_s6, %s865_s7  }
  0x4d   : > { %p1195_p3 = scmp.ne.s32.totalorder %s1189_s21, 0 }
  0x4e   : > { %p1196_p7 = scmp.ne.s32.totalorder (!%p1195_p3), %s1185_s17, 0 }
  0x4f   : > { %185 = sbr.rel (%p1195_p3) target bundleno = 451 (0x1c3), region = 28 }
  0x56   : > { %828 = dma.done.wait (%p1196_p7), [#allocation4], 512  }
  0x57   : > { %830 = vsyncadd (%p1196_p7), [#allocation4], 4294966784  ;;  %s1048_s16 = sand.u32 1, %s845_s10   ;;  %p1197_p13 = scmp.ne.s32.totalorder %s1187_s19, 0 }
  0x58   : > { %s533_s8 = sshll.u32 %s1048_s16, 9  ;;  %s192_s27 = scalar_lea.sflag [#allocation7], %s1048_s16 }
  0x59   : > { %s1052_s22 = scalar_lea.vmem [#allocation6], %s533_s8 }
  0x5a   : > { %832 = dma.done.wait (%p1197_p13), %s192_s27, 8192  }
  0x5b   : > { %834 = vsyncadd (%p1197_p13), %s192_s27, 4294959104  ;;  %v239_v0 = vld [vmem:[%s1052_s22 + $0x8] sm:$0xff]  ;;  %v241_v1 = vld [vmem:[%s1052_s22 + $0x18] sm:$0xff]  ;;  %s534_s17 = sshll.u32 %s1048_s16, 5  ;;  %s542_s6 = sshll.u32 %s853_s12, 8 }
  0x5c   : > { %v238_v2 = vld [vmem:[%s1052_s22] sm:$0xff]  ;;  %v543_v3 = vpack.c.bf16 %v241_v1, %v239_v0  ;;  %v240_v4 = vld [vmem:[%s1052_s22 + $0x10] sm:$0xff]  ;;  %v243_v5 = vld [vmem:[%s1052_s22 + $0x28] sm:$0xff]  ;;  %s215_s19 = scalar_lea.vmem [#allocation8], %s534_s17  ;;  %s1129_s5 = scalar_lea.hbm %s1180_s2, %s542_s6 }
  0x5d   : > { %v245_v6 = vld [vmem:[%s1052_s22 + $0x38] sm:$0xff]  ;;  %v545_v7 = vpack.c.bf16 %v240_v4, %v238_v2  ;;  %v242_v9 = vld [vmem:[%s1052_s22 + $0x20] sm:$0xff]  ;;  %v244_v10 = vld [vmem:[%s1052_s22 + $0x30] sm:$0xff]  ;;  %s415_s21 = sshll.u32 %s215_s19, 4  ;;  %s399_s15 = scalar_lea.sflag [#allocation5], %s1048_s16  ;;  %s1124_s21 = int_to_ptr.vmem [resolvable:$true] %s415_s21 }
  0x5e   : > { %v547_v8 = vpack.c.bf16 %v245_v6, %v243_v5  ;;  %544 = vmatprep.subr.bf16.mxu0 %v543_v3  ;;  %607 = vmatprep.subr.bf16.mxu1 %v543_v3  ;;  %v247_v11 = vld [vmem:[%s1052_s22 + $0x48] sm:$0xff]  ;;  %v249_v12 = vld [vmem:[%s1052_s22 + $0x58] sm:$0xff]  ;;  %v549_v13 = vpack.c.bf16 %v244_v10, %v242_v9  ;;  %v246_v15 = vld [vmem:[%s1052_s22 + $0x40] sm:$0xff]  ;;  %s775_s12 = scalar_lea.vmem %s1124_s21, 512  ;;  %s867_s29 = smov [#allocation8]  }
  0x5f   : > { %546 = vmatpush1.bf16.xpose.msra.mxu0 %v545_v7  ;;  %623 = vmatpush1.bf16.xpose.msra.mxu1 %v545_v7  ;;  %v551_v14 = vpack.c.bf16 %v249_v12, %v247_v11  ;;  %v248_v16 = vld [vmem:[%s1052_s22 + $0x50] sm:$0xff]  ;;  %v251_v17 = vld [vmem:[%s1052_s22 + $0x68] sm:$0xff]  ;;  %v253_v18 = vld [vmem:[%s1052_s22 + $0x78] sm:$0xff]  ;;  %p776_p4 = scmp.ne.s32.totalorder %s1124_s21, %s775_s12  ;;  %s779_s30 = sshll.u32 %s867_s29, 4  ;;  %s780_s30 = int_to_ptr.vmem [resolvable:$false] %s779_s30 }
  0x60   : > { %548 = vmatprep.subr.bf16.mxu0 %v547_v8  ;;  %608 = vmatprep.subr.bf16.mxu1 %v547_v8  ;;  %v553_v19 = vpack.c.bf16 %v248_v16, %v246_v15  ;;  %v555_v20 = vpack.c.bf16 %v253_v18, %v251_v17  ;;  %v250_v21 = vld [vmem:[%s1052_s22 + $0x60] sm:$0xff]  ;;  %v252_v22 = vld [vmem:[%s1052_s22 + $0x70] sm:$0xff]  ;;  %v235_v23 = vld [vmem:[#allocation3 + $0x8] sm:$0xff]  ;;  %s781_s23 = scalar_lea.vmem %s780_s30, 1024  ;;  %p782_p12 = scmp.lt.s32.totalorder %s1124_s21, %s780_s30 }
  0x61   : > { %v237_v24 = vld [vmem:[#allocation3 + $0x18] sm:$0xff]  ;;  %v255_v25 = vld [vmem:[%s1052_s22 + $0x88] sm:$0xff]  ;;  %366 = vmatprep.mubr.f32.mxu0 %v235_v23  ;;  %v557_v27 = vpack.c.bf16 %v252_v22, %v250_v21  ;;  %v254_v29 = vld [vmem:[%s1052_s22 + $0x80] sm:$0xff]  ;;  %p777_p6 = pnand %p776_p4, %p985_p10  ;;  %p783_p11 = scmp.lt.s32.totalorder %s781_s23, %s775_s12 }
  0x62   : > { %v257_v26 = vld [vmem:[%s1052_s22 + $0x98] sm:$0xff]  ;;  %372 = vmatprep.mubr.f32.mxu1 %v237_v24  ;;  %v256_v30 = vld [vmem:[%s1052_s22 + $0x90] sm:$0xff]  ;;  %v259_v31 = vld [vmem:[%s1052_s22 + $0xa8] sm:$0xff] }
  0x63   : > { %v559_v28 = vpack.c.bf16 %v257_v26, %v255_v25  ;;  %v261_v32 = vld [vmem:[%s1052_s22 + $0xb8] sm:$0xff]  ;;  %v561_v33 = vpack.c.bf16 %v256_v30, %v254_v29  ;;  %v258_v35 = vld [vmem:[%s1052_s22 + $0xa0] sm:$0xff]  ;;  %v260_v36 = vld [vmem:[%s1052_s22 + $0xb0] sm:$0xff]  ;;  %p778_p8 = pneg %p777_p6  ;;  %p784_p0 = por %p783_p11, %p782_p12 }
  0x64   : > { %v563_v34 = vpack.c.bf16 %v261_v32, %v259_v31  ;;  %v263_v37 = vld [vmem:[%s1052_s22 + $0xc8] sm:$0xff]  ;;  %v265_v38 = vld [vmem:[%s1052_s22 + $0xd8] sm:$0xff]  ;;  %v565_v39 = vpack.c.bf16 %v260_v36, %v258_v35  ;;  %v262_v41 = vld [vmem:[%s1052_s22 + $0xc0] sm:$0xff] }
  0x65   : > { %v567_v40 = vpack.c.bf16 %v265_v38, %v263_v37  ;;  %v264_v42 = vld [vmem:[%s1052_s22 + $0xd0] sm:$0xff]  ;;  %v267_v43 = vld [vmem:[%s1052_s22 + $0xe8] sm:$0xff]  ;;  %v269_v44 = vld [vmem:[%s1052_s22 + $0xf8] sm:$0xff]  ;;  %p785_p5 = pnand %p784_p0, %p778_p8 }
  0x66   : > { %v569_v45 = vpack.c.bf16 %v264_v42, %v262_v41  ;;  %v571_v46 = vpack.c.bf16 %v269_v44, %v267_v43  ;;  %v266_v47 = vld [vmem:[%s1052_s22 + $0xe0] sm:$0xff]  ;;  %v268_v48 = vld [vmem:[%s1052_s22 + $0xf0] sm:$0xff]  ;;  %v271_v49 = vld [vmem:[%s1052_s22 + $0x108] sm:$0xff] }
  0x67   : > { %550 = vmatpush1.bf16.xpose.msra.mxu0 %v549_v13  ;;  %624 = vmatpush1.bf16.xpose.msra.mxu1 %v549_v13  ;;  %v273_v50 = vld [vmem:[%s1052_s22 + $0x118] sm:$0xff]  ;;  %v573_v51 = vpack.c.bf16 %v268_v48, %v266_v47  ;;  %v270_v53 = vld [vmem:[%s1052_s22 + $0x100] sm:$0xff]  ;;  %v272_v54 = vld [vmem:[%s1052_s22 + $0x110] sm:$0xff] }
  0x68   : > { %552 = vmatprep.subr.bf16.mxu0 %v551_v14  ;;  %609 = vmatprep.subr.bf16.mxu1 %v551_v14  ;;  %v575_v52 = vpack.c.bf16 %v273_v50, %v271_v49  ;;  %v275_v55 = vld [vmem:[%s1052_s22 + $0x128] sm:$0xff]  ;;  %v277_v56 = vld [vmem:[%s1052_s22 + $0x138] sm:$0xff]  ;;  %v577_v57 = vpack.c.bf16 %v272_v54, %v270_v53  ;;  %v274_v59 = vld [vmem:[%s1052_s22 + $0x120] sm:$0xff] }
  0x69   : > { %v579_v58 = vpack.c.bf16 %v277_v56, %v275_v55  ;;  %v276_v60 = vld [vmem:[%s1052_s22 + $0x130] sm:$0xff]  ;;  %v279_v61 = vld [vmem:[%s1052_s22 + $0x148] sm:$0xff]  ;;  %v281_v62 = vld [vmem:[%s1052_s22 + $0x158] sm:$0xff] }
  0x6a   : > { %v581_v63 = vpack.c.bf16 %v276_v60, %v274_v59  ;;  %v583_v0 = vpack.c.bf16 %v281_v62, %v279_v61  ;;  %v278_v1 = vld [vmem:[%s1052_s22 + $0x140] sm:$0xff]  ;;  %v280_v2 = vld [vmem:[%s1052_s22 + $0x150] sm:$0xff]  ;;  %v283_v3 = vld [vmem:[%s1052_s22 + $0x168] sm:$0xff] }
  0x6b   : > { %v285_v4 = vld [vmem:[%s1052_s22 + $0x178] sm:$0xff]  ;;  %v585_v5 = vpack.c.bf16 %v280_v2, %v278_v1  ;;  %v282_v7 = vld [vmem:[%s1052_s22 + $0x160] sm:$0xff]  ;;  %v284_v8 = vld [vmem:[%s1052_s22 + $0x170] sm:$0xff] }
  0x6c   : > { %v587_v6 = vpack.c.bf16 %v285_v4, %v283_v3  ;;  %v287_v9 = vld [vmem:[%s1052_s22 + $0x188] sm:$0xff]  ;;  %v289_v10 = vld [vmem:[%s1052_s22 + $0x198] sm:$0xff]  ;;  %v589_v11 = vpack.c.bf16 %v284_v8, %v282_v7  ;;  %v286_v13 = vld [vmem:[%s1052_s22 + $0x180] sm:$0xff] }
  0x6d   : > { %v591_v12 = vpack.c.bf16 %v289_v10, %v287_v9  ;;  %v288_v14 = vld [vmem:[%s1052_s22 + $0x190] sm:$0xff]  ;;  %v291_v15 = vld [vmem:[%s1052_s22 + $0x1a8] sm:$0xff]  ;;  %v293_v16 = vld [vmem:[%s1052_s22 + $0x1b8] sm:$0xff] }
  0x6e   : > { %v593_v17 = vpack.c.bf16 %v288_v14, %v286_v13  ;;  %v595_v18 = vpack.c.bf16 %v293_v16, %v291_v15  ;;  %v295_v21 = vld [vmem:[%s1052_s22 + $0x1c8] sm:$0xff]  ;;  %v297_v22 = vld [vmem:[%s1052_s22 + $0x1d8] sm:$0xff]  ;;  %v294_v25 = vld [vmem:[%s1052_s22 + $0x1c0] sm:$0xff] }
  0x6f   : > { %554 = vmatpush1.bf16.xpose.msra.mxu0 %v553_v19  ;;  %625 = vmatpush1.bf16.xpose.msra.mxu1 %v553_v19  ;;  %v290_v19 = vld [vmem:[%s1052_s22 + $0x1a0] sm:$0xff]  ;;  %v599_v24 = vpack.c.bf16 %v297_v22, %v295_v21  ;;  %v296_v26 = vld [vmem:[%s1052_s22 + $0x1d0] sm:$0xff] }
  0x70   : > { %556 = vmatprep.subr.bf16.mxu0 %v555_v20  ;;  %610 = vmatprep.subr.bf16.mxu1 %v555_v20  ;;  %v292_v20 = vld [vmem:[%s1052_s22 + $0x1b0] sm:$0xff]  ;;  %v601_v29 = vpack.c.bf16 %v296_v26, %v294_v25  ;;  %v298_v31 = vld [vmem:[%s1052_s22 + $0x1e0] sm:$0xff] }
  0x71   : > { %v597_v23 = vpack.c.bf16 %v292_v20, %v290_v19  ;;  %v300_v32 = vld [vmem:[%s1052_s22 + $0x1f0] sm:$0xff] }
  0x72   : > { %v236_v35 = vld [vmem:[#allocation3 + $0x10] sm:$0xff] }
  0x77   : > { %558 = vmatpush1.bf16.xpose.msra.mxu0 %v557_v27  ;;  %626 = vmatpush1.bf16.xpose.msra.mxu1 %v557_v27  ;;  %v299_v27 = vld [vmem:[%s1052_s22 + $0x1e8] sm:$0xff] }
  0x78   : > { %560 = vmatprep.subr.bf16.mxu0 %v559_v28  ;;  %611 = vmatprep.subr.bf16.mxu1 %v559_v28  ;;  %v301_v28 = vld [vmem:[%s1052_s22 + $0x1f8] sm:$0xff] }
  0x79   : > { %v603_v30 = vpack.c.bf16 %v301_v28, %v299_v27 }
  0x7f   : > { %562 = vmatpush1.bf16.xpose.msra.mxu0 %v561_v33  ;;  %627 = vmatpush1.bf16.xpose.msra.mxu1 %v561_v33  ;;  %v605_v33 = vpack.c.bf16 %v300_v32, %v298_v31 }
  0x80   : > { %564 = vmatprep.subr.bf16.mxu0 %v563_v34  ;;  %612 = vmatprep.subr.bf16.mxu1 %v563_v34  ;;  %v234_v34 = vld [vmem:[#allocation3] sm:$0xff] }
  0x87   : > { %566 = vmatpush1.bf16.xpose.msra.mxu0 %v565_v39  ;;  %628 = vmatpush1.bf16.xpose.msra.mxu1 %v565_v39 }
  0x88   : > { %568 = vmatprep.subr.bf16.mxu0 %v567_v40  ;;  %613 = vmatprep.subr.bf16.mxu1 %v567_v40 }
  0x8f   : > { %570 = vmatpush1.bf16.xpose.msra.mxu0 %v569_v45  ;;  %629 = vmatpush1.bf16.xpose.msra.mxu1 %v569_v45 }
  0x90   : > { %572 = vmatprep.subr.bf16.mxu0 %v571_v46  ;;  %614 = vmatprep.subr.bf16.mxu1 %v571_v46 }
  0x97   : > { %574 = vmatpush1.bf16.xpose.msra.mxu0 %v573_v51  ;;  %630 = vmatpush1.bf16.xpose.msra.mxu1 %v573_v51 }
  0x98   : > { %576 = vmatprep.subr.bf16.mxu0 %v575_v52  ;;  %615 = vmatprep.subr.bf16.mxu1 %v575_v52 }
  0x9f   : > { %578 = vmatpush1.bf16.xpose.msra.mxu0 %v577_v57  ;;  %631 = vmatpush1.bf16.xpose.msra.mxu1 %v577_v57 }
  0xa0   : > { %580 = vmatprep.subr.bf16.mxu0 %v579_v58  ;;  %616 = vmatprep.subr.bf16.mxu1 %v579_v58 }
  0xa7   : > { %582 = vmatpush1.bf16.xpose.msra.mxu0 %v581_v63  ;;  %632 = vmatpush1.bf16.xpose.msra.mxu1 %v581_v63 }
  0xa8   : > { %584 = vmatprep.subr.bf16.mxu0 %v583_v0  ;;  %617 = vmatprep.subr.bf16.mxu1 %v583_v0 }
  0xaf   : > { %586 = vmatpush1.bf16.xpose.msra.mxu0 %v585_v5  ;;  %633 = vmatpush1.bf16.xpose.msra.mxu1 %v585_v5 }
  0xb0   : > { %588 = vmatprep.subr.bf16.mxu0 %v587_v6  ;;  %618 = vmatprep.subr.bf16.mxu1 %v587_v6 }
  0xb7   : > { %590 = vmatpush1.bf16.xpose.msra.mxu0 %v589_v11  ;;  %634 = vmatpush1.bf16.xpose.msra.mxu1 %v589_v11 }
  0xb8   : > { %592 = vmatprep.subr.bf16.mxu0 %v591_v12  ;;  %619 = vmatprep.subr.bf16.mxu1 %v591_v12 }
  0xbf   : > { %594 = vmatpush1.bf16.xpose.msra.mxu0 %v593_v17  ;;  %635 = vmatpush1.bf16.xpose.msra.mxu1 %v593_v17 }
  0xc0   : > { %596 = vmatprep.subr.bf16.mxu0 %v595_v18  ;;  %620 = vmatprep.subr.bf16.mxu1 %v595_v18 }
  0xc7   : > { %598 = vmatpush1.bf16.xpose.msra.mxu0 %v597_v23  ;;  %636 = vmatpush1.bf16.xpose.msra.mxu1 %v597_v23 }
  0xc8   : > { %600 = vmatprep.subr.bf16.mxu0 %v599_v24  ;;  %621 = vmatprep.subr.bf16.mxu1 %v599_v24 }
  0xcf   : > { %602 = vmatpush1.bf16.xpose.msra.mxu0 %v601_v29  ;;  %637 = vmatpush1.bf16.xpose.msra.mxu1 %v601_v29 }
  0xd0   : > { %604 = vmatprep.subr.bf16.mxu0 %v603_v30  ;;  %622 = vmatprep.subr.bf16.mxu1 %v603_v30 }
  0xd7   : > { %606 = vmatpush1.bf16.xpose.msra.mxu0 %v605_v33  ;;  %638 = vmatpush1.bf16.xpose.msra.mxu1 %v605_v33 }
  0xde   : > { %367 = vmatmul.mubr.f32.vlgmr.msra.gmra.mrb[0].mxu0 %v234_v34  ;;  %373 = vmatmul.mubr.f32.vlgmr.msra.gmra.mrb[0].mxu1 %v236_v35 }
 0x1b1   : > { %v368_v36 = vpop.f32.mrb[0].mxu0  ;;  %v374_v37 = vpop.f32.mrb[0].mxu1 }
 0x1b2   : > { %394 = vst [vmem:[%s215_s19] sm:$0xff] %v368_v36  ;;  %396 = vst [vmem:[%s215_s19 + $0x10] sm:$0xff] %v374_v37  ;;  %v370_v38 = vpop.f32.mrb[1].mxu0  ;;  %v376_v39 = vpop.f32.mrb[1].mxu1 }
 0x1b3   : > { %395 = vst [vmem:[%s215_s19 + $0x8] sm:$0xff] %v370_v38  ;;  %397 = vst [vmem:[%s215_s19 + $0x18] sm:$0xff] %v376_v39 }
 0x1b4   : > { %788 = shalt.err (!%p785_p5)
}
 0x1b5   : > { %s789_s3 = scalar_lea.hbm %s1129_s5, 512  ;;  %s793_s8 = scalar_lea.hbm %s1180_s2, 1024 }
 0x1b6   : > { %p790_p9 = scmp.ne.s32.totalorder %s1129_s5, %s789_s3  ;;  %p794_p3 = scmp.lt.u32.totalorder %s1129_s5, %s1180_s2 }
 0x1b7   : > { %p795_p7 = scmp.lt.u32.totalorder %s793_s8, %s789_s3  ;;  %p797_p4 = scmp.lt.u32.totalorder %s789_s3, %s1129_s5 }
 0x1b8   : > { %p791_p1 = pnand %p790_p9, %p985_p10 }
 0x1b9   : > { %p796_p13 = por %p795_p7, %p794_p3 }
 0x1ba   : > { %p792_p2 = pneg %p791_p1 }
 0x1bb   : > { %p798_p6 = por %p797_p4, %p796_p13 }
 0x1bd   : > { %p799_p8 = pnand %p798_p6, %p792_p2 }
 0x1bf   : > { %802 = shalt.err (!%p799_p8)
}
 0x1c0   : > { %s868_s17 = smov 256   ;;  %s869_s19 = smov 512  }
 0x1c1   : > { %s870_s6 = smov 16  }
 0x1c2   : > { %645 = dma.vmem_to_hbm [thread:$0]  (%p985_p10), %s1124_s21, 512, %s1129_s5, %s399_s15, %s868_s17, %s869_s19, %s870_s6  }
 0x1c3 PF: > { %s430_s7 = sand.u32 1, %s841_s9   ;;  %p1198_p12 = scmp.ne.s32.totalorder %s1188_s20, 0 }
 0x1c4   : > { %p1199_p11 = scmp.ge.s32.totalorder %s861_s14, 2  ;;  %s431_s4 = scalar_lea.sflag [#allocation5], %s430_s7 }
 0x1c6   : > { %p656_p0 = pnand %p1199_p11, %p1198_p12 }
 0x1c8   : > { %836 = dma.done.wait (!%p656_p0), %s431_s4, 512  }
 0x1c9   : > { %838 = vsyncadd (!%p656_p0), %s431_s4, 4294966784  ;;  %s19_s14 = sadd.s32 1, %s861_s14   ;;  %s1200_s9 = smov %s845_s10 }
 0x1ca   : > { %p16_p5 = scmp.ge.s32.totalorder %s19_s14, 4   ;;  %s1201_s10 = smov %s849_s11 }
 0x1cb   : > { %s1202_s11 = smov %s994_s28  ;;  %s1203_s12 = smov %s857_s13 }
 0x1cc   : > { %s1204_s13 = smov %s1206_s25  ;;  %18 = sbr.rel (!%p16_p5) target bundleno = 7 (0x7), region = 87 }
 0x1d3   :  { %436 = vsyncpa [#allocation4], 1 }
 0x1d4   :  { %438 = vsyncpa [#allocation4 + $0x1], 1 }
 0x1d5   :  { %439 = vsyncpa [#allocation7], 1 }
 0x1d6   :  { %441 = vsyncpa [#allocation7 + $0x1], 1 }
 0x1d7   :  { %442 = vsyncpa [#allocation5], 1 }
 0x1d8   :  { %444 = vsyncpa [#allocation5 + $0x1], 1 }

</bundles_post_ra>
